<compile_context>
chip_gen: v6e
topology: v6e:2x2x1
jax: 0.10.0
libtpu: 0.0.40
codegen_flags: <defaults>
</compile_context>

<pallas_src>
import jax
import jax.numpy as jnp
from jax.experimental import pallas as pl
from jax.experimental.pallas import tpu as pltpu

EPS = 1e-5  # nn.LayerNorm default


# ---------------------------- small helpers ----------------------------
def _round_up(x, m):
    return ((x + m - 1) // m) * m


def _sublane_pack(dtype):
    # f32 -> 8, bf16 -> 16, int8/fp8 -> 32 sublanes per packed vreg row
    return max(8, 32 // jnp.dtype(dtype).itemsize)


def _vmem_budgets():
    """Per-generation VMEM limits: ~75% of physical capacity, capped at 96 MiB.
    v5e/v6e (128 MiB) -> 96 MiB limit; v7x (64 MiB) -> 48 MiB limit."""
    cap = 64 * 1024 * 1024
    try:
        info = pltpu.get_tpu_info()
        cap = int(getattr(info, "vmem_capacity_bytes", cap)) or cap
    except Exception:
        pass
    vmem_limit = max(32 * 1024 * 1024, min(cap * 3 // 4, 96 * 1024 * 1024))
    tile_budget = vmem_limit * 3 // 5
    return vmem_limit, tile_budget


def _ln_f32(x, g, b):
    """LayerNorm over last axis; f32 stats, biased variance (PyTorch).
    One-pass variance E[x^2] - mean^2 so the two lane reductions don't serialize."""
    xf = x.astype(jnp.float32)
    mean = jnp.mean(xf, axis=-1, keepdims=True)
    meansq = jnp.mean(xf * xf, axis=-1, keepdims=True)
    var = jnp.maximum(meansq - mean * mean, 0.0)
    return (xf - mean) * jax.lax.rsqrt(var + EPS) * g + b


# ---------------------------- fused kernels ----------------------------
def _prenorm_ctx_norm_kernel(x_ref, c_ref, gx_ref, bx_ref, gc_ref, bc_ref,
                             w_ref, bias_ref, o_ref):
    xn = _ln_f32(x_ref[...], gx_ref[...], bx_ref[...])
    cn = _ln_f32(c_ref[...], gc_ref[...], bc_ref[...])
    # single K = D + C matmul against the pre-concatenated [Wx; Wc]
    act = jnp.concatenate([xn.astype(w_ref.dtype), cn.astype(w_ref.dtype)], axis=-1)
    acc = jnp.dot(act, w_ref[...], preferred_element_type=jnp.float32)
    o_ref[...] = (acc + bias_ref[...]).astype(o_ref.dtype)


def _prenorm_ctx_kernel(x_ref, c_ref, gx_ref, bx_ref, w_ref, bias_ref, o_ref):
    # PreNorm built with context_dim=None: context passes through un-normalized.
    xn = _ln_f32(x_ref[...], gx_ref[...], bx_ref[...])
    act = jnp.concatenate([xn.astype(w_ref.dtype), c_ref[...].astype(w_ref.dtype)],
                          axis=-1)
    acc = jnp.dot(act, w_ref[...], preferred_element_type=jnp.float32)
    o_ref[...] = (acc + bias_ref[...]).astype(o_ref.dtype)


def _prenorm_noctx_kernel(x_ref, gx_ref, bx_ref, w_ref, bias_ref, o_ref):
    xn = _ln_f32(x_ref[...], gx_ref[...], bx_ref[...])
    acc = jnp.dot(xn.astype(w_ref.dtype), w_ref[...],
                  preferred_element_type=jnp.float32)
    o_ref[...] = (acc + bias_ref[...]).astype(o_ref.dtype)


# ---------------------------- tiling helper ----------------------------
def _choose_tile_n(n_rows, k_total, dout, act_isz, w_isz, out_isz,
                   tile_budget, pack):
    """Largest pack-aligned row tile whose double-buffered footprint fits."""
    # Residents (weights + LN params + bias) budgeted at 2x: the pipeline
    # double-buffers them even with a constant index_map.
    resident = 2 * (k_total * dout * w_isz + (2 * k_total + dout) * 4)
    tile = pack
    for cand in (2048, 1024, 512, 256, 128, 64, 32, 16, 8):
        if cand % pack:
            continue
        streamed = 2 * cand * (k_total * act_isz + dout * out_isz)  # x+ctx in, out
        if resident + streamed <= tile_budget:
            tile = cand
            break
    # keep >= 2 grid steps so the "parallel" row axis shards across v7x's 2 TCs
    if n_rows > 2 * pack:
        tile = min(tile, _round_up(-(-n_rows // 2), pack))
    return max(pack, min(tile, _round_up(n_rows, pack)))


# ---------------------------- forward wrapper ----------------------------
def prenorm_forward(params, x, context=None, *, tile_n=None,
                    compute_dtype=jnp.bfloat16):
    """PreNorm forward with fn(x, context) = x @ Wx + context @ Wc + bias.
    LN stats + accumulator stay f32; big streamed arrays use `compute_dtype`."""
    *lead, D = x.shape
    out_dtype = x.dtype
    Dout = params["wx"].shape[1]

    x2d = x.reshape(-1, D).astype(compute_dtype)
    N = x2d.shape[0]

    gx = params["g_x"].reshape(1, D).astype(jnp.float32)
    bx = params["b_x"].reshape(1, D).astype(jnp.float32)
    bias = params["bias"].reshape(1, Dout).astype(jnp.float32)

    has_ctx = context is not None
    has_norm_ctx = has_ctx and params.get("g_ctx") is not None
    C = context.shape[-1] if has_ctx else 0
    if has_ctx:
        # fn here is a per-token projection; context rows must align with x rows.
        assert context.shape[:-1] == x.shape[:-1], (
            f"context leading shape {context.shape[:-1]} must match x "
            f"{tuple(x.shape[:-1])}")

    act_isz = jnp.dtype(compute_dtype).itemsize
    out_isz = jnp.dtype(out_dtype).itemsize
    pack = max(_sublane_pack(compute_dtype), _sublane_pack(out_dtype))
    vmem_limit, tile_budget = _vmem_budgets()

    if tile_n is None:
        tile_n = _choose_tile_n(N, D + C, Dout, act_isz, act_isz, out_isz,
                                tile_budget, pack)
    tile_n = max(pack, min(_round_up(tile_n, pack), _round_up(N, pack)))

    # Ragged last block is masked by Pallas; no host-side pad / slice passes.
    grid = (pl.cdiv(N, tile_n),)

    cparams = pltpu.CompilerParams(
        dimension_semantics=("parallel",),
        vmem_limit_bytes=vmem_limit,
    )

    def row_spec(feat):
        return pl.BlockSpec((tile_n, feat), lambda i: (i, 0))

    def const_spec(r, c):
        return pl.BlockSpec((r, c), lambda i: (0, 0))

    if has_ctx:
        c2d = context.reshape(-1, C).astype(compute_dtype)
        # Pre-concatenate [Wx; Wc] so the kernel does one K = D + C matmul
        # (fills the 256-deep MXU on v6e/v7x when D = C = 128).
        w_cat = jnp.concatenate([params["wx"], params["wc"]],
                                axis=0).astype(compute_dtype)
        if has_norm_ctx:
            gc = params["g_ctx"].reshape(1, C).astype(jnp.float32)
            bc = params["b_ctx"].reshape(1, C).astype(jnp.float32)
            kernel = _prenorm_ctx_norm_kernel
            extra_args, extra_specs = (gc, bc), [const_spec(1, C), const_spec(1, C)]
        else:
            kernel = _prenorm_ctx_kernel
            extra_args, extra_specs = (), []
        out2d = pl.pallas_call(
            kernel,
            out_shape=jax.ShapeDtypeStruct((N, Dout), out_dtype),
            grid=grid,
            in_specs=[row_spec(D), row_spec(C),
                      const_spec(1, D), const_spec(1, D),
                      *extra_specs,
                      const_spec(D + C, Dout), const_spec(1, Dout)],
            out_specs=row_spec(Dout),
            compiler_params=cparams,
        )(x2d, c2d, gx, bx, *extra_args, w_cat, bias)
    else:
        w = params["wx"].astype(compute_dtype)
        out2d = pl.pallas_call(
            _prenorm_noctx_kernel,
            out_shape=jax.ShapeDtypeStruct((N, Dout), out_dtype),
            grid=grid,
            in_specs=[row_spec(D),
                      const_spec(1, D), const_spec(1, D),
                      const_spec(D, Dout), const_spec(1, Dout)],
            out_specs=row_spec(Dout),
            compiler_params=cparams,
        )(x2d, gx, bx, w, bias)

    return out2d.reshape(*lead, Dout)


# ---------------------------- pure-JAX reference ----------------------------
def _ln_ref(x, g, b):
    mean = jnp.mean(x, axis=-1, keepdims=True)
    var = jnp.mean((x - mean) ** 2, axis=-1, keepdims=True)
    return (x - mean) * jax.lax.rsqrt(var + EPS) * g + b


def prenorm_ref(params, x, context=None):
    xn = _ln_ref(x, params["g_x"], params["b_x"])
    out = xn @ params["wx"] + params["bias"]
    if context is not None:
        cn = _ln_ref(context, params["g_ctx"], params["b_ctx"]) \
            if params.get("g_ctx") is not None else context
        out = out + cn @ params["wc"]
    return out


if __name__ == "__main__":
    # Lane-dense (128-aligned) feature dims; S chosen so N=112 exercises the
    # masked ragged last block (tile_n auto-selects 64 -> 2 grid steps).
    B, S, D, C = 2, 56, 128, 128
    Dout = D

    key = jax.random.PRNGKey(0)
    kx, kc, kwx, kwc, kb = jax.random.split(key, 5)

    x = jax.random.normal(kx, (B, S, D), dtype=jnp.float32)
    context = jax.random.normal(kc, (B, S, C), dtype=jnp.float32)

    params = {
        # nn.LayerNorm default init: weight=1, bias=0
        "g_x": jnp.ones((D,), jnp.float32),
        "b_x": jnp.zeros((D,), jnp.float32),
        "g_ctx": jnp.ones((C,), jnp.float32),
        "b_ctx": jnp.zeros((C,), jnp.float32),
        # fn's projection weights (deterministic synthetic init)
        "wx": jax.random.normal(kwx, (D, Dout), jnp.float32) * 0.05,
        "wc": jax.random.normal(kwc, (C, Dout), jnp.float32) * 0.05,
        "bias": jax.random.normal(kb, (Dout,), jnp.float32) * 0.05,
    }

    tol = dict(atol=5e-2, rtol=5e-2)  # bf16 MXU path vs f32 reference

    # 1) context + norm_context path (both LayerNorms + fused K=D+C projection)
    out = jax.block_until_ready(prenorm_forward(params, x, context=context))
    ref = prenorm_ref(params, x, context=context)
    assert out.shape == (B, S, Dout)
    assert jnp.allclose(out, ref, **tol), "ctx+norm path mismatch vs reference"

    # 2) context without norm_context (PreNorm built with context_dim=None)
    params_nonorm = dict(params, g_ctx=None, b_ctx=None)
    out2 = jax.block_until_ready(prenorm_forward(params_nonorm, x, context=context))
    ref2 = prenorm_ref(params_nonorm, x, context=context)
    assert jnp.allclose(out2, ref2, **tol), "ctx no-norm path mismatch vs reference"

    # 3) no-context path
    out3 = jax.block_until_ready(prenorm_forward(params, x, context=None))
    ref3 = prenorm_ref(params, x, context=None)
    assert jnp.allclose(out3, ref3, **tol), "no-ctx path mismatch vs reference"

    print("KERNEL_OK")
</pallas_src>

<mosaic_0001>
module attributes {stable_mosaic.version = 11 : i64} {
  func.func @_prenorm_ctx_norm_kernel(%arg0: i32, %arg1: memref<64x128xbf16, #tpu.memory_space<vmem>>, %arg2: memref<64x128xbf16, #tpu.memory_space<vmem>>, %arg3: memref<1x128xf32, #tpu.memory_space<vmem>>, %arg4: memref<1x128xf32, #tpu.memory_space<vmem>>, %arg5: memref<1x128xf32, #tpu.memory_space<vmem>>, %arg6: memref<1x128xf32, #tpu.memory_space<vmem>>, %arg7: memref<256x128xbf16, #tpu.memory_space<vmem>>, %arg8: memref<1x128xf32, #tpu.memory_space<vmem>>, %arg9: memref<64x128xf32, #tpu.memory_space<vmem>>) attributes {dimension_semantics = [#tpu.dimension_semantics<parallel>], iteration_bounds = array<i64: 2>, scalar_prefetch = 0 : i64, scratch_operands = 0 : i64, tpu.core_type = #tpu.core_type<tc>, window_params = [{transform_indices = @transform_0, window_bounds = array<i64: 64, 128>}, {transform_indices = @transform_1, window_bounds = array<i64: 64, 128>}, {pipeline_mode = #tpu.pipeline_mode<synchronous>, transform_indices = @transform_2, window_bounds = array<i64: 1, 128>}, {pipeline_mode = #tpu.pipeline_mode<synchronous>, transform_indices = @transform_3, window_bounds = array<i64: 1, 128>}, {pipeline_mode = #tpu.pipeline_mode<synchronous>, transform_indices = @transform_4, window_bounds = array<i64: 1, 128>}, {pipeline_mode = #tpu.pipeline_mode<synchronous>, transform_indices = @transform_5, window_bounds = array<i64: 1, 128>}, {pipeline_mode = #tpu.pipeline_mode<synchronous>, transform_indices = @transform_6, window_bounds = array<i64: 256, 128>}, {pipeline_mode = #tpu.pipeline_mode<synchronous>, transform_indices = @transform_7, window_bounds = array<i64: 1, 128>}, {transform_indices = @transform_8, window_bounds = array<i64: 64, 128>}]} {
    %c0 = arith.constant 0 : index
    %c0_0 = arith.constant 0 : index
    %0 = vector.load %arg1[%c0, %c0_0] : memref<64x128xbf16, #tpu.memory_space<vmem>>, vector<64x128xbf16>
    %c0_1 = arith.constant 0 : index
    %c0_2 = arith.constant 0 : index
    %1 = vector.load %arg3[%c0_1, %c0_2] : memref<1x128xf32, #tpu.memory_space<vmem>>, vector<1x128xf32>
    %c0_3 = arith.constant 0 : index
    %c0_4 = arith.constant 0 : index
    %2 = vector.load %arg4[%c0_3, %c0_4] : memref<1x128xf32, #tpu.memory_space<vmem>>, vector<1x128xf32>
    %3 = arith.extf %0 : vector<64x128xbf16> to vector<64x128xf32>
    %cst = arith.constant dense<0.000000e+00> : vector<64xf32>
    %4 = vector.multi_reduction <add>, %3, %cst [1] : vector<64x128xf32> to vector<64xf32>
    %5 = vector.shape_cast %4 : vector<64xf32> to vector<64x1xf32>
    %cst_5 = arith.constant 1.280000e+02 : f32
    %6 = vector.broadcast %cst_5 : f32 to vector<64x1xf32>
    %7 = arith.divf %5, %6 : vector<64x1xf32>
    %8 = arith.mulf %3, %3 : vector<64x128xf32>
    %cst_6 = arith.constant dense<0.000000e+00> : vector<64xf32>
    %9 = vector.multi_reduction <add>, %8, %cst_6 [1] : vector<64x128xf32> to vector<64xf32>
    %10 = vector.shape_cast %9 : vector<64xf32> to vector<64x1xf32>
    %cst_7 = arith.constant 1.280000e+02 : f32
    %11 = vector.broadcast %cst_7 : f32 to vector<64x1xf32>
    %12 = arith.divf %10, %11 : vector<64x1xf32>
    %13 = arith.mulf %7, %7 : vector<64x1xf32>
    %14 = arith.subf %12, %13 : vector<64x1xf32>
    %cst_8 = arith.constant 0.000000e+00 : f32
    %15 = vector.broadcast %cst_8 : f32 to vector<64x1xf32>
    %16 = arith.maximumf %14, %15 : vector<64x1xf32>
    %17 = vector.broadcast %7 : vector<64x1xf32> to vector<64x128xf32>
    %18 = arith.subf %3, %17 : vector<64x128xf32>
    %cst_9 = arith.constant 9.99999974E-6 : f32
    %19 = vector.broadcast %cst_9 : f32 to vector<64x1xf32>
    %20 = arith.addf %16, %19 : vector<64x1xf32>
    %21 = math.rsqrt %20 : vector<64x1xf32>
    %22 = vector.broadcast %21 : vector<64x1xf32> to vector<64x128xf32>
    %23 = arith.mulf %18, %22 : vector<64x128xf32>
    %24 = vector.broadcast %1 : vector<1x128xf32> to vector<64x128xf32>
    %25 = arith.mulf %23, %24 : vector<64x128xf32>
    %26 = vector.broadcast %2 : vector<1x128xf32> to vector<64x128xf32>
    %27 = arith.addf %25, %26 : vector<64x128xf32>
    %c0_10 = arith.constant 0 : index
    %c0_11 = arith.constant 0 : index
    %28 = vector.load %arg2[%c0_10, %c0_11] : memref<64x128xbf16, #tpu.memory_space<vmem>>, vector<64x128xbf16>
    %c0_12 = arith.constant 0 : index
    %c0_13 = arith.constant 0 : index
    %29 = vector.load %arg5[%c0_12, %c0_13] : memref<1x128xf32, #tpu.memory_space<vmem>>, vector<1x128xf32>
    %c0_14 = arith.constant 0 : index
    %c0_15 = arith.constant 0 : index
    %30 = vector.load %arg6[%c0_14, %c0_15] : memref<1x128xf32, #tpu.memory_space<vmem>>, vector<1x128xf32>
    %31 = arith.extf %28 : vector<64x128xbf16> to vector<64x128xf32>
    %cst_16 = arith.constant dense<0.000000e+00> : vector<64xf32>
    %32 = vector.multi_reduction <add>, %31, %cst_16 [1] : vector<64x128xf32> to vector<64xf32>
    %33 = vector.shape_cast %32 : vector<64xf32> to vector<64x1xf32>
    %cst_17 = arith.constant 1.280000e+02 : f32
    %34 = vector.broadcast %cst_17 : f32 to vector<64x1xf32>
    %35 = arith.divf %33, %34 : vector<64x1xf32>
    %36 = arith.mulf %31, %31 : vector<64x128xf32>
    %cst_18 = arith.constant dense<0.000000e+00> : vector<64xf32>
    %37 = vector.multi_reduction <add>, %36, %cst_18 [1] : vector<64x128xf32> to vector<64xf32>
    %38 = vector.shape_cast %37 : vector<64xf32> to vector<64x1xf32>
    %cst_19 = arith.constant 1.280000e+02 : f32
    %39 = vector.broadcast %cst_19 : f32 to vector<64x1xf32>
    %40 = arith.divf %38, %39 : vector<64x1xf32>
    %41 = arith.mulf %35, %35 : vector<64x1xf32>
    %42 = arith.subf %40, %41 : vector<64x1xf32>
    %cst_20 = arith.constant 0.000000e+00 : f32
    %43 = vector.broadcast %cst_20 : f32 to vector<64x1xf32>
    %44 = arith.maximumf %42, %43 : vector<64x1xf32>
    %45 = vector.broadcast %35 : vector<64x1xf32> to vector<64x128xf32>
    %46 = arith.subf %31, %45 : vector<64x128xf32>
    %cst_21 = arith.constant 9.99999974E-6 : f32
    %47 = vector.broadcast %cst_21 : f32 to vector<64x1xf32>
    %48 = arith.addf %44, %47 : vector<64x1xf32>
    %49 = math.rsqrt %48 : vector<64x1xf32>
    %50 = vector.broadcast %49 : vector<64x1xf32> to vector<64x128xf32>
    %51 = arith.mulf %46, %50 : vector<64x128xf32>
    %52 = vector.broadcast %29 : vector<1x128xf32> to vector<64x128xf32>
    %53 = arith.mulf %51, %52 : vector<64x128xf32>
    %54 = vector.broadcast %30 : vector<1x128xf32> to vector<64x128xf32>
    %55 = arith.addf %53, %54 : vector<64x128xf32>
    %56 = arith.truncf %27 : vector<64x128xf32> to vector<64x128xbf16>
    %57 = arith.truncf %55 : vector<64x128xf32> to vector<64x128xbf16>
    %58 = tpu.concatenate %56, %57 in 1 : vector<64x128xbf16>, vector<64x128xbf16> -> vector<64x256xbf16>
    %c0_22 = arith.constant 0 : index
    %c0_23 = arith.constant 0 : index
    %59 = vector.load %arg7[%c0_22, %c0_23] : memref<256x128xbf16, #tpu.memory_space<vmem>>, vector<256x128xbf16>
    %cst_24 = arith.constant dense<0.000000e+00> : vector<64x128xf32>
    %60 = tpu.matmul %58, %59, %cst_24 {dimension_numbers = #tpu.dot_dimension_numbers<[1], [0], [0], [1], [0, 0, 1, 1], [], []>} : vector<64x256xbf16>, vector<256x128xbf16>, vector<64x128xf32> -> vector<64x128xf32>
    %c0_25 = arith.constant 0 : index
    %c0_26 = arith.constant 0 : index
    %61 = vector.load %arg8[%c0_25, %c0_26] : memref<1x128xf32, #tpu.memory_space<vmem>>, vector<1x128xf32>
    %62 = vector.broadcast %61 : vector<1x128xf32> to vector<64x128xf32>
    %63 = arith.addf %60, %62 : vector<64x128xf32>
    %c0_27 = arith.constant 0 : index
    %c0_28 = arith.constant 0 : index
    %64 = vector.load %arg9[%c0_27, %c0_28] : memref<64x128xf32, #tpu.memory_space<vmem>>, vector<64x128xf32>
    tpu.vector_store %arg9[%c0_27, %c0_28], %63 {strides = array<i32>} : memref<64x128xf32, #tpu.memory_space<vmem>>, vector<64x128xf32>,
    return
  }
  func.func @transform_0(%arg0: i32) -> (i32, i32) {
    %c0_i32 = arith.constant 0 : i32
    %c0_i32_0 = arith.constant 0 : i32
    return %arg0, %c0_i32 : i32, i32
  }
  func.func @transform_1(%arg0: i32) -> (i32, i32) {
    %c0_i32 = arith.constant 0 : i32
    %c0_i32_0 = arith.constant 0 : i32
    return %arg0, %c0_i32 : i32, i32
  }
  func.func @transform_2(%arg0: i32) -> (i32, i32) {
    %c0_i32 = arith.constant 0 : i32
    %c0_i32_0 = arith.constant 0 : i32
    %c0_i32_1 = arith.constant 0 : i32
    return %c0_i32, %c0_i32_0 : i32, i32
  }
  func.func @transform_3(%arg0: i32) -> (i32, i32) {
    %c0_i32 = arith.constant 0 : i32
    %c0_i32_0 = arith.constant 0 : i32
    %c0_i32_1 = arith.constant 0 : i32
    return %c0_i32, %c0_i32_0 : i32, i32
  }
  func.func @transform_4(%arg0: i32) -> (i32, i32) {
    %c0_i32 = arith.constant 0 : i32
    %c0_i32_0 = arith.constant 0 : i32
    %c0_i32_1 = arith.constant 0 : i32
    return %c0_i32, %c0_i32_0 : i32, i32
  }
  func.func @transform_5(%arg0: i32) -> (i32, i32) {
    %c0_i32 = arith.constant 0 : i32
    %c0_i32_0 = arith.constant 0 : i32
    %c0_i32_1 = arith.constant 0 : i32
    return %c0_i32, %c0_i32_0 : i32, i32
  }
  func.func @transform_6(%arg0: i32) -> (i32, i32) {
    %c0_i32 = arith.constant 0 : i32
    %c0_i32_0 = arith.constant 0 : i32
    %c0_i32_1 = arith.constant 0 : i32
    return %c0_i32, %c0_i32_0 : i32, i32
  }
  func.func @transform_7(%arg0: i32) -> (i32, i32) {
    %c0_i32 = arith.constant 0 : i32
    %c0_i32_0 = arith.constant 0 : i32
    %c0_i32_1 = arith.constant 0 : i32
    return %c0_i32, %c0_i32_0 : i32, i32
  }
  func.func @transform_8(%arg0: i32) -> (i32, i32) {
    %c0_i32 = arith.constant 0 : i32
    %c0_i32_0 = arith.constant 0 : i32
    return %arg0, %c0_i32 : i32, i32
  }
}

</mosaic_0001>

<bundles_post_ra>
// kernel: tpu_custom_call.1
= control target key start
LH: loop header
LB: loop body
LE: loop exit
PB: predicated region body
PF: predicated region fallthrough
CT: control target
= control target key end

     0   :  { %s2027_s0 = inlined_call_operand.hbm [shape: bf16[112,128], index: 0, kind: input, shape index: {}]   ;;  %s2028_s1 = inlined_call_operand.hbm [shape: bf16[112,128], index: 1, kind: input, shape index: {}]   ;;  %s2029_s2 = inlined_call_operand.vmem [shape: f32[1,128], index: 2, kind: input, shape index: {}]   ;;  %s2030_s3 = inlined_call_operand.vmem [shape: f32[1,128], index: 3, kind: input, shape index: {}]   ;;  %s2031_s4 = inlined_call_operand.vmem [shape: f32[1,128], index: 4, kind: input, shape index: {}]   ;;  %s2032_s5 = inlined_call_operand.vmem [shape: f32[1,128], index: 5, kind: input, shape index: {}]   ;;  %s2033_s6 = inlined_call_operand.hbm [shape: bf16[256,128], index: 6, kind: input, shape index: {}]   ;;  %s2034_s7 = inlined_call_operand.vmem [shape: f32[1,128], index: 7, kind: input, shape index: {}]   ;;  %s2035_s8 = inlined_call_operand.hbm [shape: f32[112,128], index: 8, kind: output, shape index: {}]  }
   0x1   :  { %2042 = sst [smem:[#allocation16_spill]] %s2033_s6 }
   0x2   :  { %13 = vsyncpa [#allocation3], 0 }
   0x3   :  { %15 = vsyncpa [#allocation3 + $0x1], 0 }
   0x4   :  { %16 = vsyncpa [#allocation6], 0 }
   0x5   :  { %18 = vsyncpa [#allocation6 + $0x1], 0 }
   0x6   :  { %19 = vsyncpa [#allocation4], 0 }
   0x7   :  { %21 = vsyncpa [#allocation4 + $0x1], 0  ;;  %s1530_s27 = smov 0   ;;  %s1532_s28 = smov 0  }
   0x8   :  { %s1534_s29 = smov 0   ;;  %s1536_s30 = smov 0  }
   0x9 LB: > { %s1551_s9 = sadd.s32 4294967295, %s1471_s30   ;;  %s1064_s10 = sadd.s32 4294967294, %s1471_s30   ;;  %s1471_s30 = sphi %s1536_s30, %s2059_s30   ;;  %s1467_s29 = sphi %s1534_s29, %s2063_s29   ;;  %s1463_s28 = sphi %s1532_s28, %s2062_s28   ;;  %s1459_s27 = sphi %s1530_s27, %s2061_s27  }
   0xa   : > { %s1555_s11 = sadd.s32 1, %s1471_s30   ;;  %s34_s12 = sadd.s32 1, %s1467_s29 }
   0xb   : > { %2043 = sst [smem:[#allocation13_spill]] %s1555_s11  ;;  %s31_s13 = ssub.s32 %s1471_s30, %s1555_s11 }
   0xc   : > { %p41_p0 = scmp.ne.s32.totalorder %s1467_s29, %s1463_s28  ;;  %p32_p1 = scmp.eq.s32.totalorder %s31_s13, 0 }
   0xd   : > { %p42_p2 = scmp.eq.s32.totalorder %s1471_s30, 0  ;;  %p47_p3 = scmp.ne.s32.totalorder %s1463_s28, %s1459_s27 }
   0xe   : > { %p2041_p4 = scmp.eq.s32.totalorder %s1551_s9, 0  ;;  %p223_p7 = scmp.eq.s32.totalorder %s1551_s9, 1 }
   0xf   : > { %s1567_s14 = scalar_select %p32_p1, %s1467_s29, %s34_s12  }
  0x10   : > { %p1569_p5 = por %p42_p2, %p41_p0  ;;  %p1575_p6 = por %p2041_p4, %p47_p3 }
  0x11   : > { %2044 = sst [smem:[#allocation14_spill]] %s1567_s14  ;;  %p229_p8 = scmp.eq.s32.totalorder %s1064_s10, 1 }
  0x12   : > { %s2046_s16 = scalar_select %p1575_p6, 1, 0 }
  0x13   : > { %p1065_p9 = scmp.ge.s32.totalorder %s1471_s30, 1  ;;  %p236_p10 = scmp.lt.s32.totalorder %s1471_s30, 3 }
  0x14   : > { %p1582_p11 = por %p223_p7, %p41_p0  ;;  %p1586_p12 = por %p229_p8, %p47_p3 }
  0x15   : > { %p1590_p13 = pnand %p1065_p9, %p236_p10  ;;  %s1473_s20 = smov [#allocation7]  }
  0x16   : > { %s2047_s17 = scalar_select %p1582_p11, 1, 0 }
  0x17   : > { %s2048_s18 = scalar_select %p1586_p12, 1, 0 }
  0x18   : > { %p1221_p1 = pneg %p1590_p13  ;;  %s260_s21 = sshll.u32 %s1473_s20, 4  ;;  %s261_s21 = int_to_ptr.vmem [resolvable:$true] %s260_s21 }
  0x19   : > { %2049 = sst [smem:[#allocation15_spill]] %s2048_s18  ;;  %s1332_s22 = scalar_lea.vmem %s261_s21, 2048 }
  0x1a   : > { %p1222_p2 = pnand %p1221_p1, %p2041_p4  ;;  %p1333_p7 = scmp.ne.s32.totalorder %s261_s21, %s1332_s22 }
  0x1b   : > { %p1340_p8 = scmp.lt.s32.totalorder %s261_s21, %s261_s21  ;;  %p1341_p6 = scmp.lt.s32.totalorder %s1332_s22, %s1332_s22 }
  0x1c   : > { %p1323_p0 = pneg %p1222_p2 }
  0x1d   : > { %p1342_p12 = por %p1341_p6, %p1340_p8 }
  0x1e   : > { %p1335_p11 = pnand %p1333_p7, %p1323_p0 }
  0x20   : > { %p1336_p3 = pneg %p1335_p11 }
  0x22   : > { %p1343_p9 = pnand %p1342_p12, %p1336_p3 }
  0x24   : > { %1346 = shalt.err (!%p1343_p9)
}
  0x25   : > { %s1474_s23 = smov 64   ;;  %s1475_s24 = smov 4  }
  0x26   : > { %s2051_s6 = sld [smem:[#allocation16_spill]]  ;;  %p2040_p10 = scmp.ge.s32.totalorder %s1471_s30, 2 }
  0x28   : > { %273 = sbr.rel (%p2040_p10) target bundleno = 109 (0x6d), region = 40 }
  0x2c   : > { %1224 = dma.hbm_to_vmem [thread:$0]  (!%p1222_p2), %s2051_s6, 2048, %s261_s21, [#allocation6], %s1474_s23, %s1474_s23, %s1475_s24  }
  0x2d   : > { %276 = sbr.rel (!%p1569_p5) target bundleno = 77 (0x4d), region = 44  ;;  %s277_s10 = sand.u32 (%p1569_p5), 1, %s1467_s29  }
  0x2e   : > { %s1069_s12 = sshll.u32 (%p1569_p5), %s1471_s30, 3  ;;  %s1068_s13 = sshll.u32 (%p1569_p5), %s277_s10, 5 }
  0x2f   : > { %s283_s20 = ssub.s32 (%p1569_p5), 14, %s1069_s12  ;;  %s1611_s23 = scalar_lea.sflag (%p1569_p5), [#allocation3], %s277_s10 }
  0x30   : > { %p284_p6 = scmp.lt.s32.totalorder (%p1569_p5), %s283_s20, 8  ;;  %s281_s24 = scalar_lea.vmem (%p1569_p5), [#allocation2], %s1068_s13 }
  0x32   : > { %s2065_s20 = smov (!%p284_p6, %s283_s20), 8 }
  0x33   : > { %s1608_s22 = sshll.u32 %s2065_s20, 6 }
  0x34   : > { %s288_s21 = ssub.s32 512, %s1608_s22 }
  0x35   : > { %289 = vsyncadd %s1611_s23, %s288_s21  ;;  %p1071_p11 = scmp.ne.s32.totalorder %s1608_s22, 0  ;;  %s1117_s25 = sshll.u32 %s1471_s30, 9 }
  0x36   : > { %s1619_s12 = scalar_lea.hbm %s2027_s0, %s1117_s25  ;;  %s294_s20 = sshll.u32 %s281_s24, 4  ;;  %s1621_s20 = int_to_ptr.vmem [resolvable:$true] %s294_s20 }
  0x37   : > { %s1347_s10 = scalar_lea.hbm %s1619_s12, %s1608_s22  ;;  %s1351_s14 = scalar_lea.hbm %s2027_s0, 896 }
  0x38   : > { %p1348_p12 = scmp.ne.s32.totalorder %s1619_s12, %s1347_s10  ;;  %p1352_p0 = scmp.lt.s32.totalorder %s1619_s12, %s2027_s0 }
  0x39   : > { %p1353_p7 = scmp.lt.s32.totalorder %s1351_s14, %s1347_s10 }
  0x3a   : > { %p1349_p1 = pnand %p1348_p12, %p1071_p11 }
  0x3b   : > { %p1354_p3 = por %p1353_p7, %p1352_p0 }
  0x3c   : > { %p1350_p2 = pneg %p1349_p1 }
  0x3e   : > { %p1355_p8 = pnand %p1354_p3, %p1350_p2 }
  0x40   : > { %1358 = shalt.err (!%p1355_p8)
}
  0x41   : > { %s1359_s6 = scalar_lea.vmem %s1621_s20, %s1608_s22  ;;  %s1476_s24 = smov [#allocation2]  }
  0x42   : > { %p1360_p9 = scmp.ne.s32.totalorder %s1621_s20, %s1359_s6  ;;  %s1363_s25 = sshll.u32 %s1476_s24, 4  ;;  %s1364_s25 = int_to_ptr.vmem [resolvable:$false] %s1363_s25 }
  0x43   : > { %s1365_s26 = scalar_lea.vmem %s1364_s25, 1024  ;;  %p1366_p1 = scmp.lt.s32.totalorder %s1621_s20, %s1364_s25 }
  0x44   : > { %p1361_p6 = pnand %p1360_p9, %p1071_p11  ;;  %p1367_p10 = scmp.lt.s32.totalorder %s1365_s26, %s1359_s6 }
  0x46   : > { %p1362_p12 = pneg %p1361_p6  ;;  %p1368_p4 = por %p1367_p10, %p1366_p1 }
  0x48   : > { %p1369_p0 = pnand %p1368_p4, %p1362_p12 }
  0x4a   : > { %1372 = shalt.err (!%p1369_p0)
}
  0x4b   : > { %s1477_s11 = smov 64   ;;  %s1478_s14 = smov 4  }
  0x4c   : > { %300 = dma.hbm_to_vmem [thread:$0]  (%p1071_p11), %s1619_s12, %s1608_s22, %s1621_s20, %s1611_s23, %s1477_s11, %s1477_s11, %s1478_s14  }
  0x4d PF: > { %303 = sbr.rel (!%p1569_p5) target bundleno = 109 (0x6d), region = 48  ;;  %s304_s18 = sand.u32 (%p1569_p5), 1, %s1471_s30  }
  0x4e   : > { %s306_s10 = sand.u32 (%p1569_p5), 1, %s1467_s29   ;;  %s1076_s21 = sshll.u32 (%p1569_p5), %s1471_s30, 3 }
  0x4f   : > { %s1075_s13 = sshll.u32 (%p1569_p5), %s306_s10, 5  ;;  %s310_s6 = ssub.s32 (%p1569_p5), 14, %s1076_s21 }
  0x50   : > { %p311_p4 = scmp.lt.s32.totalorder (%p1569_p5), %s310_s6, 8  ;;  %s1655_s26 = scalar_lea.sflag (%p1569_p5), [#allocation6], %s304_s18 }
  0x51   : > { %s308_s22 = scalar_lea.vmem (%p1569_p5), [#allocation5], %s1075_s13 }
  0x52   : > { %s2067_s6 = smov (!%p311_p4, %s310_s6), 8 }
  0x53   : > { %s1652_s24 = sshll.u32 %s2067_s6, 6 }
  0x54   : > { %s315_s25 = ssub.s32 512, %s1652_s24 }
  0x55   : > { %316 = vsyncadd %s1655_s26, %s315_s25  ;;  %p1078_p5 = scmp.ne.s32.totalorder %s1652_s24, 0  ;;  %s1118_s15 = sshll.u32 %s1471_s30, 9 }
  0x56   : > { %s1663_s20 = scalar_lea.hbm %s2028_s1, %s1118_s15  ;;  %s321_s11 = sshll.u32 %s308_s22, 4  ;;  %s1665_s11 = int_to_ptr.vmem [resolvable:$true] %s321_s11 }
  0x57   : > { %s1373_s14 = scalar_lea.hbm %s1663_s20, %s1652_s24  ;;  %s1377_s13 = scalar_lea.hbm %s2028_s1, 896 }
  0x58   : > { %p1374_p10 = scmp.ne.s32.totalorder %s1663_s20, %s1373_s14  ;;  %p1378_p7 = scmp.lt.s32.totalorder %s1663_s20, %s2028_s1 }
  0x59   : > { %p1379_p3 = scmp.lt.s32.totalorder %s1377_s13, %s1373_s14 }
  0x5a   : > { %p1375_p11 = pnand %p1374_p10, %p1078_p5 }
  0x5b   : > { %p1380_p8 = por %p1379_p3, %p1378_p7 }
  0x5c   : > { %p1376_p2 = pneg %p1375_p11 }
  0x5e   : > { %p1381_p9 = pnand %p1380_p8, %p1376_p2 }
  0x60   : > { %1384 = shalt.err (!%p1381_p9)
}
  0x61   : > { %s1385_s25 = scalar_lea.vmem %s1665_s11, %s1652_s24  ;;  %s1479_s22 = smov [#allocation5]  }
  0x62   : > { %p1386_p6 = scmp.ne.s32.totalorder %s1665_s11, %s1385_s25  ;;  %s1389_s15 = sshll.u32 %s1479_s22, 4  ;;  %s1390_s15 = int_to_ptr.vmem [resolvable:$false] %s1389_s15 }
  0x63   : > { %s1391_s23 = scalar_lea.vmem %s1390_s15, 1024  ;;  %p1392_p0 = scmp.lt.s32.totalorder %s1665_s11, %s1390_s15 }
  0x64   : > { %p1387_p12 = pnand %p1386_p6, %p1078_p5  ;;  %p1393_p4 = scmp.lt.s32.totalorder %s1391_s23, %s1385_s25 }
  0x66   : > { %p1388_p1 = pneg %p1387_p12  ;;  %p1394_p10 = por %p1393_p4, %p1392_p0 }
  0x68   : > { %p1395_p11 = pnand %p1394_p10, %p1388_p1 }
  0x6a   : > { %1398 = shalt.err (!%p1395_p11)
}
  0x6b   : > { %s1480_s12 = smov 64   ;;  %s1481_s14 = smov 4  }
  0x6c   : > { %327 = dma.hbm_to_vmem [thread:$0]  (%p1078_p5), %s1663_s20, %s1652_s24, %s1665_s11, %s1655_s26, %s1480_s12, %s1480_s12, %s1481_s14  }
  0x6d PF: > { %333 = sbr.rel (%p1590_p13) target bundleno = 584 (0x248), region = 52  ;;  %s1694_s18 = sand.u32 (!%p1590_p13), 1, %s1463_s28  }
  0x6e   : > { %s1083_s10 = sshll.u32 (!%p1590_p13), %s1694_s18, 5  ;;  %s336_s13 = scalar_lea.sflag (!%p1590_p13), [#allocation3], %s1694_s18 }
  0x6f   : > { %s1698_s21 = scalar_lea.vmem (!%p1590_p13), [#allocation2], %s1083_s10  ;;  %p2052_p2 = scmp.ne.s32.totalorder (!%p1590_p13), %s2046_s16, 0 }
  0x72   : > { %1442 = dma.done.wait (%p2052_p2), %s336_s13, 512  }
  0x73   : > { %1444 = vsyncadd (%p2052_p2), %s336_s13, 4294966784  ;;  %s344_s24 = sand.u32 1, %s1551_s9   ;;  %s1705_s26 = scalar_lea.vmem [#allocation5], %s1083_s10 }
  0x74   : > { %s345_s19 = scalar_lea.sflag [#allocation6], %s344_s24 }
  0x75   : > { %1446 = dma.done.wait (%p2052_p2), %s345_s19, 512  }
  0x76   : > { %1448 = vsyncadd (%p2052_p2), %s345_s19, 4294966784  ;;  %p2053_p13 = scmp.eq.s32.totalorder %s1551_s9, 0 }
  0x78   : > { %1450 = dma.done.wait (%p2053_p13), [#allocation6], 2048   ;;  %p2054_p5 = pmov %p2053_p13 }
  0x79   : > { %v1156_v0 = vld [vmem:[%s1705_s26 + $0x10] sm:$0xff]   ;;  %v1137_v1 = vld [vmem:[%s1705_s26] sm:$0xff]   ;;  %v1155_v20 = vld [vmem:[%s1705_s26 + $0x8] sm:$0xff]   ;;  %s1086_s12 = sshll.u32 %s1694_s18, 6  ;;  %p2055_p7 = scmp.ne.s32.totalorder %s2047_s17, 0 }
  0x7a   : > { %1452 = vsyncadd (%p2054_p5), [#allocation6], 4294965248  ;;  %v1717_v2 = vunpack.c.l.bf16 %v1156_v0  ;;  %v1719_v3 = vunpack.c.l.bf16 %v1137_v1  ;;  %v1121_v4 = vld [vmem:[%s1698_s21] sm:$0xff]   ;;  %v1724_v5 = vunpack.c.h.bf16 %v1156_v0  ;;  %v1726_v6 = vunpack.c.h.bf16 %v1137_v1  ;;  %v1153_v7 = vld [vmem:[%s1698_s21 + $0x10] sm:$0xff]   ;;  %s1955_s13 = scalar_lea.vmem [#allocation8], %s1086_s12  ;;  %s1109_s24 = sshll.u32 (%p2055_p7), %s1551_s9, 3 }
  0x7b   : > { %v1731_v8 = vunpack.c.h.bf16 %v1121_v4  ;;  %v1733_v9 = vunpack.c.l.bf16 %v1121_v4  ;;  %v1737_v10 = vunpack.c.h.bf16 %v1153_v7  ;;  %v1739_v11 = vunpack.c.l.bf16 %v1153_v7  ;;  %v1157_v23 = vld [vmem:[%s1705_s26 + $0x18] sm:$0xff]   ;;  %v1152_v28 = vld [vmem:[%s1698_s21 + $0x8] sm:$0xff]   ;;  %v1275_v29 = vld [vmem:[#allocation7 + $0x70] sm:$0xff]   ;;  %s948_s19 = ssub.s32 (%p2055_p7), 14, %s1109_s24 }
  0x7c   : > { %591 = vadd.xlane.f32.xlu1 %v1717_v2  ;;  %583 = vadd.xlane.f32.xlu0 %v1719_v3  ;;  %v608_v12 = vmul.f32 %v1726_v6, %v1726_v6  ;;  %v607_v13 = vmul.f32 %v1719_v3, %v1719_v3  ;;  %v612_v14 = vmul.f32 %v1724_v5, %v1724_v5  ;;  %v1760_v21 = vunpack.c.h.bf16 %v1155_v20  ;;  %v1273_v24 = vld [vmem:[#allocation7 + $0x78] sm:$0xff]   ;;  %v1276_v32 = vld [vmem:[#allocation7 + $0x30] sm:$0xff]   ;;  %v1277_v34 = vld [vmem:[#allocation7 + $0x68] sm:$0xff]   ;;  %p949_p3 = scmp.lt.s32.totalorder (%p2055_p7), %s948_s19, 8 }
  0x7d   : > { %v611_v15 = vmul.f32 %v1717_v2, %v1717_v2  ;;  %v450_v16 = vmul.f32 %v1731_v8, %v1731_v8  ;;  %v449_v17 = vmul.f32 %v1733_v9, %v1733_v9  ;;  %v454_v18 = vmul.f32 %v1737_v10, %v1737_v10  ;;  %v1274_v27 = vld [vmem:[#allocation7 + $0x38] sm:$0xff]   ;;  %1158 = vmatprep.subr.bf16.mxu0 %v1273_v24  ;;  %v1278_v37 = vld [vmem:[#allocation7 + $0x28] sm:$0xff]   ;;  %v1279_v38 = vld [vmem:[#allocation7 + $0x60] sm:$0xff]  }
  0x7e   : > { %v453_v19 = vmul.f32 %v1739_v11, %v1739_v11  ;;  %v1762_v22 = vunpack.c.l.bf16 %v1155_v20  ;;  %v1767_v25 = vunpack.c.h.bf16 %v1157_v23  ;;  %v1769_v26 = vunpack.c.l.bf16 %v1157_v23  ;;  %1198 = vmatprep.subr.bf16.mxu1 %v1273_v24  ;;  %1159 = vmatpush3.bf16.msra.mxu0 %v1274_v27  ;;  %v1154_v33 = vld [vmem:[%s1698_s21 + $0x18] sm:$0xff]   ;;  %v1280_v41 = vld [vmem:[#allocation7 + $0x20] sm:$0xff]   ;;  %v1283_v46 = vld [vmem:[#allocation7 + $0x50] sm:$0xff]   ;;  %s940_s21 = scalar_lea.sflag [#allocation4], %s1694_s18 }
  0x7f   : > { %1206 = vmatpush3.bf16.msra.mxu1 %v1274_v27  ;;  %v1774_v30 = vunpack.c.h.bf16 %v1152_v28  ;;  %v1776_v31 = vunpack.c.l.bf16 %v1152_v28  ;;  %1160 = vmatprep.subr.bf16.mxu0 %v1275_v29  ;;  %v1781_v35 = vunpack.c.h.bf16 %v1154_v33  ;;  %v1783_v36 = vunpack.c.l.bf16 %v1154_v33  ;;  %v1281_v42 = vld [vmem:[#allocation7 + $0x58] sm:$0xff]   ;;  %v1284_v49 = vld [vmem:[#allocation7 + $0x10] sm:$0xff]   ;;  %v1285_v50 = vld [vmem:[#allocation7 + $0x48] sm:$0xff]  }
  0x80   : > { %593 = vadd.xlane.f32.xlu1 %v1724_v5  ;;  %585 = vadd.xlane.f32.xlu0 %v1726_v6  ;;  %v610_v39 = vmul.f32 %v1760_v21, %v1760_v21  ;;  %v609_v40 = vmul.f32 %v1762_v22, %v1762_v22  ;;  %v614_v43 = vmul.f32 %v1767_v25, %v1767_v25  ;;  %v1282_v45 = vld [vmem:[#allocation7 + $0x18] sm:$0xff]   ;;  %v1286_v53 = vld [vmem:[#allocation7 + $0x8] sm:$0xff]   ;;  %v1287_v54 = vld [vmem:[#allocation7 + $0x40] sm:$0xff]  }
  0x81   : > { %1199 = vmatprep.subr.bf16.mxu1 %v1275_v29  ;;  %v613_v44 = vmul.f32 %v1769_v26, %v1769_v26  ;;  %v452_v47 = vmul.f32 %v1774_v30, %v1774_v30  ;;  %v451_v48 = vmul.f32 %v1776_v31, %v1776_v31  ;;  %v456_v51 = vmul.f32 %v1781_v35, %v1781_v35  ;;  %v1288_v55 = vld [vmem:[#allocation7] sm:$0xff]  }
  0x82   : > { %1161 = vmatpush3.bf16.msra.mxu0 %v1276_v32  ;;  %v455_v52 = vmul.f32 %v1783_v36, %v1783_v36 }
  0x83   : > { %1207 = vmatpush3.bf16.msra.mxu1 %v1276_v32  ;;  %1162 = vmatprep.subr.bf16.mxu0 %v1277_v34 }
  0x84   : > { %426 = vadd.xlane.f32.xlu1 %v1731_v8  ;;  %424 = vadd.xlane.f32.xlu0 %v1733_v9 }
  0x85   : > { %1200 = vmatprep.subr.bf16.mxu1 %v1277_v34 }
  0x86   : > { %1163 = vmatpush3.bf16.msra.mxu0 %v1278_v37 }
  0x87   : > { %1208 = vmatpush3.bf16.msra.mxu1 %v1278_v37  ;;  %1164 = vmatprep.subr.bf16.mxu0 %v1279_v38 }
  0x88   : > { %434 = vadd.xlane.f32.xlu1 %v1737_v10  ;;  %432 = vadd.xlane.f32.xlu0 %v1739_v11 }
  0x89   : > { %1201 = vmatprep.subr.bf16.mxu1 %v1279_v38 }
  0x8a   : > { %1165 = vmatpush3.bf16.msra.mxu0 %v1280_v41 }
  0x8b   : > { %1209 = vmatpush3.bf16.msra.mxu1 %v1280_v41  ;;  %1166 = vmatprep.subr.bf16.mxu0 %v1281_v42 }
  0x8c   : > { %617 = vadd.xlane.f32.xlu1 %v608_v12  ;;  %615 = vadd.xlane.f32.xlu0 %v607_v13 }
  0x8d   : > { %1202 = vmatprep.subr.bf16.mxu1 %v1281_v42 }
  0x8e   : > { %1167 = vmatpush3.bf16.msra.mxu0 %v1282_v45 }
  0x8f   : > { %1210 = vmatpush3.bf16.msra.mxu1 %v1282_v45  ;;  %1168 = vmatprep.subr.bf16.mxu0 %v1283_v46 }
  0x90   : > { %625 = vadd.xlane.f32.xlu1 %v612_v14  ;;  %623 = vadd.xlane.f32.xlu0 %v611_v15 }
  0x91   : > { %1203 = vmatprep.subr.bf16.mxu1 %v1283_v46 }
  0x92   : > { %1169 = vmatpush3.bf16.msra.mxu0 %v1284_v49 }
  0x93   : > { %1211 = vmatpush3.bf16.msra.mxu1 %v1284_v49  ;;  %1170 = vmatprep.subr.bf16.mxu0 %v1285_v50 }
  0x94   : > { %459 = vadd.xlane.f32.xlu1 %v450_v16  ;;  %457 = vadd.xlane.f32.xlu0 %v449_v17 }
  0x95   : > { %1204 = vmatprep.subr.bf16.mxu1 %v1285_v50 }
  0x96   : > { %1171 = vmatpush3.bf16.msra.mxu0 %v1286_v53 }
  0x97   : > { %1212 = vmatpush3.bf16.msra.mxu1 %v1286_v53  ;;  %1172 = vmatprep.subr.bf16.mxu0 %v1287_v54 }
  0x98   : > { %467 = vadd.xlane.f32.xlu1 %v454_v18  ;;  %465 = vadd.xlane.f32.xlu0 %v453_v19 }
  0x99   : > { %1205 = vmatprep.subr.bf16.mxu1 %v1287_v54 }
  0x9a   : > { %1173 = vmatpush3.bf16.msra.mxu0 %v1288_v55 }
  0x9b   : > { %1213 = vmatpush3.bf16.msra.mxu1 %v1288_v55 }
  0x9c   : > { %589 = vadd.xlane.f32.xlu1 %v1760_v21  ;;  %587 = vadd.xlane.f32.xlu0 %v1762_v22 }
  0xa0   : > { %597 = vadd.xlane.f32.xlu1 %v1767_v25  ;;  %595 = vadd.xlane.f32.xlu0 %v1769_v26 }
  0xa4   : > { %430 = vadd.xlane.f32.xlu1 %v1774_v30  ;;  %428 = vadd.xlane.f32.xlu0 %v1776_v31 }
  0xa8   : > { %438 = vadd.xlane.f32.xlu1 %v1781_v35  ;;  %436 = vadd.xlane.f32.xlu0 %v1783_v36 }
  0xac   : > { %621 = vadd.xlane.f32.xlu1 %v610_v39  ;;  %619 = vadd.xlane.f32.xlu0 %v609_v40 }
  0xb0   : > { %629 = vadd.xlane.f32.xlu1 %v614_v43  ;;  %627 = vadd.xlane.f32.xlu0 %v613_v44 }
  0xb4   : > { %463 = vadd.xlane.f32.xlu1 %v452_v47  ;;  %461 = vadd.xlane.f32.xlu0 %v451_v48 }
  0xb8   : > { %471 = vadd.xlane.f32.xlu1 %v456_v51  ;;  %469 = vadd.xlane.f32.xlu0 %v455_v52 }
 0x105   : > { %v592_v56 = vpop.xlane.xlu1 %591  ;;  %v584_v57 = vpop.xlane.xlu0 %583 }
 0x106   : > { %v1803_v0 = vmul.f32 0.0078125, %v584_v57  ;;  %v1807_v4 = vmul.f32 0.0078125, %v592_v56 }
 0x108   : > { %v639_v14 = vmul.f32 %v1803_v0, %v1803_v0  ;;  %v643_v20 = vmul.f32 %v1807_v4, %v1807_v4 }
 0x109   : > { %v594_v58 = vpop.xlane.xlu1 %593  ;;  %v586_v59 = vpop.xlane.xlu0 %585 }
 0x10a   : > { %v1805_v1 = vmul.f32 0.0078125, %v586_v59  ;;  %v1809_v7 = vmul.f32 0.0078125, %v594_v58 }
 0x10c   : > { %v640_v15 = vmul.f32 %v1805_v1, %v1805_v1  ;;  %v644_v23 = vmul.f32 %v1809_v7, %v1809_v7 }
 0x10d   : > { %v427_v60 = vpop.xlane.xlu1 %426  ;;  %v425_v61 = vpop.xlane.xlu0 %424 }
 0x10e   : > { %v1819_v24 = vmul.f32 0.0078125, %v427_v60  ;;  %v1821_v37 = vmul.f32 0.0078125, %v425_v61 }
 0x110   : > { %v482_v42 = vmul.f32 %v1819_v24, %v1819_v24  ;;  %v481_v50 = vmul.f32 %v1821_v37, %v1821_v37 }
 0x111   : > { %v435_v62 = vpop.xlane.xlu1 %434  ;;  %v433_v63 = vpop.xlane.xlu0 %432 }
 0x112   : > { %v1825_v43 = vmul.f32 0.0078125, %v435_v62  ;;  %v1827_v44 = vmul.f32 0.0078125, %v433_v63 }
 0x114   : > { %v486_v55 = vmul.f32 %v1825_v43, %v1825_v43  ;;  %v485_v56 = vmul.f32 %v1827_v44, %v1827_v44 }
 0x115   : > { %v618_v12 = vpop.xlane.xlu1 %617  ;;  %v616_v13 = vpop.xlane.xlu0 %615 }
 0x116   : > { %v632_v16 = vmul.f32 0.0078125, %v618_v12  ;;  %v631_v17 = vmul.f32 0.0078125, %v616_v13 }
 0x118   : > { %v648_v18 = vsub.f32 %v632_v16, %v640_v15  ;;  %v647_v19 = vsub.f32 %v631_v17, %v639_v14 }
 0x119   : > { %v626_v27 = vpop.xlane.xlu1 %625  ;;  %v624_v28 = vpop.xlane.xlu0 %623 }
 0x11a   : > { %v656_v29 = vmax.f32 %v648_v18, 0.0  ;;  %v655_v32 = vmax.f32 %v647_v19, 0.0  ;;  %v636_v33 = vmul.f32 0.0078125, %v626_v27  ;;  %v635_v34 = vmul.f32 0.0078125, %v624_v28 }
 0x11c   : > { %v672_v38 = vadd.f32 1e-05, %v656_v29  ;;  %v671_v39 = vadd.f32 1e-05, %v655_v32  ;;  %v652_v40 = vsub.f32 %v636_v33, %v644_v23  ;;  %v651_v41 = vsub.f32 %v635_v34, %v643_v20 }
 0x11d   : > { %v460_v45 = vpop.xlane.xlu1 %459  ;;  %v458_v46 = vpop.xlane.xlu0 %457  ;;  %v663_v32 = vsub.f32 %v1719_v3, %v1803_v0  ;;  %v664_v33 = vsub.f32 %v1726_v6, %v1805_v1  ;;  %v667_v6 = vsub.f32 %v1717_v2, %v1807_v4  ;;  %v668_v0 = vsub.f32 %v1724_v5, %v1809_v7 }
 0x11e   : > { %1289 = vrsqrt.f32 %v672_v38  ;;  %v660_v47 = vmax.f32 %v652_v40, 0.0  ;;  %v659_v48 = vmax.f32 %v651_v41, 0.0  ;;  %v474_v49 = vmul.f32 0.0078125, %v460_v45  ;;  %v1842_v38 = vld [vmem:[%s2031_s4] ss:$0 sm:$0xff] }
 0x11f   : > { %1291 = vrsqrt.f32 %v671_v39  ;;  %v473_v51 = vmul.f32 0.0078125, %v458_v46  ;;  %v1847_v45 = vld [vmem:[%s2032_s5] ss:$0 sm:$0xff]  ;;  %v506_v2 = vsub.f32 %v1731_v8, %v1819_v24  ;;  %v509_v8 = vsub.f32 %v1739_v11, %v1827_v44 }
 0x120   : > { %v676_v52 = vadd.f32 1e-05, %v660_v47  ;;  %v675_v53 = vadd.f32 1e-05, %v659_v48  ;;  %v490_v54 = vsub.f32 %v474_v49, %v482_v42 }
 0x121   : > { %v489_v57 = vsub.f32 %v473_v51, %v481_v50  ;;  %v468_v58 = vpop.xlane.xlu1 %467  ;;  %v466_v59 = vpop.xlane.xlu0 %465 }
 0x122   : > { %1293 = vrsqrt.f32 %v676_v52  ;;  %v498_v60 = vmax.f32 %v490_v54, 0.0  ;;  %v478_v61 = vmul.f32 0.0078125, %v468_v58  ;;  %v477_v62 = vmul.f32 0.0078125, %v466_v59 }
 0x123   : > { %1295 = vrsqrt.f32 %v675_v53  ;;  %v497_v63 = vmax.f32 %v489_v57, 0.0 }
 0x124   : > { %v514_v12 = vadd.f32 1e-05, %v498_v60  ;;  %v494_v13 = vsub.f32 %v478_v61, %v486_v55  ;;  %v493_v14 = vsub.f32 %v477_v62, %v485_v56  ;;  %v505_v55 = vsub.f32 %v1733_v9, %v1821_v37  ;;  %v1880_v9 = vld [vmem:[%s2029_s2] ss:$0 sm:$0xff] }
 0x125   : > { %v513_v15 = vadd.f32 1e-05, %v497_v63  ;;  %v590_v16 = vpop.xlane.xlu1 %589  ;;  %v588_v17 = vpop.xlane.xlu0 %587  ;;  %v510_v60 = vsub.f32 %v1737_v10, %v1825_v43 }
 0x126   : > { %1297 = vrsqrt.f32 %v514_v12  ;;  %v502_v18 = vmax.f32 %v494_v13, 0.0  ;;  %v501_v19 = vmax.f32 %v493_v14, 0.0  ;;  %v1855_v48 = vmul.f32 0.0078125, %v590_v16 }
 0x127   : > { %1299 = vrsqrt.f32 %v513_v15  ;;  %v1861_v4 = vmul.f32 0.0078125, %v588_v17  ;;  %v1891_v15 = vld [vmem:[%s2030_s3] ss:$0 sm:$0xff] }
 0x128   : > { %v518_v20 = vadd.f32 1e-05, %v502_v18  ;;  %v517_v23 = vadd.f32 1e-05, %v501_v19  ;;  %v642_v24 = vmul.f32 %v1855_v48, %v1855_v48 }
 0x129   : > { %v598_v27 = vpop.xlane.xlu1 %597  ;;  %v596_v28 = vpop.xlane.xlu0 %595  ;;  %v641_v11 = vmul.f32 %v1861_v4, %v1861_v4 }
 0x12a   : > { %1301 = vrsqrt.f32 %v518_v20  ;;  %v1863_v5 = vmul.f32 0.0078125, %v598_v27  ;;  %v1875_v61 = vmul.f32 0.0078125, %v596_v28 }
 0x12b   : > { %v1290_v29 = vpop.eup %1289  ;;  %1303 = vrsqrt.f32 %v517_v23 }
 0x12c   : > { %v1292_v34 = vpop.eup %1291  ;;  %v688_v42 = vmul.f32 %v1290_v29, %v664_v33  ;;  %v646_v44 = vmul.f32 %v1863_v5, %v1863_v5  ;;  %v645_v27 = vmul.f32 %v1875_v61, %v1875_v61 }
 0x12d   : > { %v431_v39 = vpop.xlane.xlu1 %430  ;;  %v429_v40 = vpop.xlane.xlu0 %428  ;;  %v687_v41 = vmul.f32 %v1292_v34, %v663_v32 }
 0x12e   : > { %v702_v46 = vmul.f32 %v1842_v38, %v688_v42  ;;  %v1893_v17 = vmul.f32 0.0078125, %v431_v39  ;;  %v1899_v33 = vmul.f32 0.0078125, %v429_v40 }
 0x12f   : > { %v1294_v3 = vpop.eup %1293  ;;  %v701_v1 = vmul.f32 %v1842_v38, %v687_v41 }
 0x130   : > { %v1296_v47 = vpop.eup %1295  ;;  %v716_v52 = vadd.f32 %v1847_v45, %v702_v46  ;;  %v692_v54 = vmul.f32 %v1294_v3, %v668_v0 }
 0x131   : > { %v439_v49 = vpop.xlane.xlu1 %438  ;;  %v437_v50 = vpop.xlane.xlu0 %436  ;;  %v715_v51 = vadd.f32 %v1847_v45, %v701_v1  ;;  %v691_v53 = vmul.f32 %v1296_v47, %v667_v6  ;;  %v484_v47 = vmul.f32 %v1893_v17, %v1893_v17 }
 0x132   : > { %v706_v58 = vmul.f32 %v1842_v38, %v692_v54 }
 0x133   : > { %v1298_v7 = vpop.eup %1297  ;;  %v727_v56 = vpack.c.bf16 %v716_v52, %v715_v51  ;;  %v705_v57 = vmul.f32 %v1842_v38, %v691_v53 }
 0x134   : > { %v1300_v59 = vpop.eup %1299  ;;  %v720_v10 = vadd.f32 %v1847_v45, %v706_v58  ;;  %v530_v12 = vmul.f32 %v1298_v7, %v506_v2 }
 0x135   : > { %898 = vmatprep.mubr.bf16.mxu0 %v727_v56  ;;  %v622_v37 = vpop.xlane.xlu1 %621  ;;  %v620_v62 = vpop.xlane.xlu0 %619  ;;  %v719_v63 = vadd.f32 %v1847_v45, %v705_v57  ;;  %v529_v43 = vmul.f32 %v1300_v59, %v505_v55  ;;  %v1907_v55 = vmul.f32 0.0078125, %v439_v49  ;;  %v1909_v56 = vmul.f32 0.0078125, %v437_v50 }
 0x136   : > { %v634_v13 = vmul.f32 0.0078125, %v622_v37  ;;  %v633_v14 = vmul.f32 0.0078125, %v620_v62  ;;  %v544_v20 = vmul.f32 %v1880_v9, %v530_v12  ;;  %v483_v62 = vmul.f32 %v1899_v33, %v1899_v33 }
 0x137   : > { %v1302_v16 = vpop.eup %1301  ;;  %v729_v18 = vpack.c.bf16 %v720_v10, %v719_v63  ;;  %v543_v19 = vmul.f32 %v1880_v9, %v529_v43  ;;  %v488_v12 = vmul.f32 %v1907_v55, %v1907_v55 }
 0x138   : > { %v1304_v23 = vpop.eup %1303  ;;  %v650_v28 = vsub.f32 %v634_v13, %v642_v24  ;;  %v649_v29 = vsub.f32 %v633_v14, %v641_v11  ;;  %v534_v32 = vmul.f32 %v1302_v16, %v510_v60  ;;  %v558_v42 = vadd.f32 %v1891_v15, %v544_v20 }
 0x139   : > { %914 = vmatprep.mubr.bf16.mxu1 %v729_v18  ;;  %v630_v34 = vpop.xlane.xlu1 %629  ;;  %v628_v41 = vpop.xlane.xlu0 %627  ;;  %v557_v39 = vadd.f32 %v1891_v15, %v543_v19  ;;  %v533_v3 = vmul.f32 %v1304_v23, %v509_v8  ;;  %v487_v11 = vmul.f32 %v1909_v56, %v1909_v56 }
 0x13a   : > { %v658_v6 = vmax.f32 %v650_v28, 0.0  ;;  %v657_v0 = vmax.f32 %v649_v29, 0.0  ;;  %v638_v1 = vmul.f32 0.0078125, %v630_v34  ;;  %v637_v46 = vmul.f32 0.0078125, %v628_v41 }
 0x13b   : > { %v723_v51 = vpack.c.bf16 %v558_v42, %v557_v39  ;;  %v547_v52 = vmul.f32 %v1880_v9, %v533_v3  ;;  %v548_v40 = vmul.f32 %v1880_v9, %v534_v32  ;;  %v666_v42 = vsub.f32 %v1760_v21, %v1855_v48 }
 0x13c   : > { %v674_v53 = vadd.f32 1e-05, %v658_v6  ;;  %v673_v54 = vadd.f32 1e-05, %v657_v0  ;;  %v654_v2 = vsub.f32 %v638_v1, %v646_v44  ;;  %v653_v7 = vsub.f32 %v637_v46, %v645_v27 }
 0x13d   : > { %899 = vmatmul.mubr.bf16.vlgmr.msra.gmra.mxu0 %v723_v51  ;;  %v464_v57 = vpop.xlane.xlu1 %463  ;;  %v462_v58 = vpop.xlane.xlu0 %461  ;;  %v561_v59 = vadd.f32 %v1891_v15, %v547_v52  ;;  %v562_v60 = vadd.f32 %v1891_v15, %v548_v40  ;;  %v665_v6 = vsub.f32 %v1762_v22, %v1861_v4  ;;  %v669_v40 = vsub.f32 %v1769_v26, %v1875_v61 }
 0x13e   : > { %1305 = vrsqrt.f32 %v674_v53  ;;  %v662_v8 = vmax.f32 %v654_v2, 0.0  ;;  %v661_v24 = vmax.f32 %v653_v7, 0.0  ;;  %v476_v37 = vmul.f32 0.0078125, %v464_v57 }
 0x13f   : > { %1307 = vrsqrt.f32 %v673_v54  ;;  %v475_v63 = vmul.f32 0.0078125, %v462_v58  ;;  %v725_v49 = vpack.c.bf16 %v562_v60, %v561_v59  ;;  %v508_v2 = vsub.f32 %v1774_v30, %v1893_v17 }
 0x140   : > { %v678_v10 = vadd.f32 1e-05, %v662_v8  ;;  %v677_v50 = vadd.f32 1e-05, %v661_v24  ;;  %v492_v43 = vsub.f32 %v476_v37, %v484_v47  ;;  %v670_v47 = vsub.f32 %v1767_v25, %v1863_v5 }
 0x141   : > { %v491_v44 = vsub.f32 %v475_v63, %v483_v62  ;;  %915 = vmatmul.mubr.bf16.vlgmr.msra.gmra.mxu1 %v725_v49  ;;  %v472_v13 = vpop.xlane.xlu1 %471  ;;  %v470_v14 = vpop.xlane.xlu0 %469  ;;  %v507_v7 = vsub.f32 %v1776_v31, %v1899_v33  ;;  %v512_v30 = vsub.f32 %v1781_v35, %v1907_v55  ;;  %v511_v31 = vsub.f32 %v1783_v36, %v1909_v56 }
 0x142   : > { %1309 = vrsqrt.f32 %v678_v10  ;;  %v500_v16 = vmax.f32 %v492_v43, 0.0  ;;  %v480_v18 = vmul.f32 0.0078125, %v472_v13  ;;  %v479_v19 = vmul.f32 0.0078125, %v470_v14 }
 0x143   : > { %1311 = vrsqrt.f32 %v677_v50  ;;  %v499_v20 = vmax.f32 %v491_v44, 0.0 }
 0x144   : > { %v516_v23 = vadd.f32 1e-05, %v500_v16  ;;  %v496_v27 = vsub.f32 %v480_v18, %v488_v12  ;;  %v495_v28 = vsub.f32 %v479_v19, %v487_v11  ;;  %v1091_v12 = vld [vmem:[%s2034_s7] ss:$0 sm:$0xff] }
 0x145   : > { %v515_v29 = vadd.f32 1e-05, %v499_v20 }
 0x146   : > { %1313 = vrsqrt.f32 %v516_v23  ;;  %v504_v32 = vmax.f32 %v496_v27, 0.0  ;;  %v503_v34 = vmax.f32 %v495_v28, 0.0 }
 0x147   : > { %1315 = vrsqrt.f32 %v515_v29 }
 0x148   : > { %v520_v41 = vadd.f32 1e-05, %v504_v32  ;;  %v519_v39 = vadd.f32 1e-05, %v503_v34 }
 0x14a   : > { %1317 = vrsqrt.f32 %v520_v41 }
 0x14b   : > { %v1306_v3 = vpop.eup %1305  ;;  %1319 = vrsqrt.f32 %v519_v39 }
 0x14c   : > { %v1308_v0 = vpop.eup %1307  ;;  %v690_v1 = vmul.f32 %v1306_v3, %v666_v42 }
 0x14d   : > { %v689_v46 = vmul.f32 %v1308_v0, %v665_v6 }
 0x14e   : > { %v704_v51 = vmul.f32 %v1842_v38, %v690_v1 }
 0x14f   : > { %v1310_v52 = vpop.eup %1309  ;;  %v703_v21 = vmul.f32 %v1842_v38, %v689_v46 }
 0x150   : > { %v1312_v48 = vpop.eup %1311  ;;  %v718_v53 = vadd.f32 %v1847_v45, %v704_v51  ;;  %v694_v54 = vmul.f32 %v1310_v52, %v670_v47 }
 0x151   : > { %v717_v22 = vadd.f32 %v1847_v45, %v703_v21  ;;  %v693_v4 = vmul.f32 %v1312_v48, %v669_v40 }
 0x152   : > { %v708_v25 = vmul.f32 %v1842_v38, %v694_v54 }
 0x153   : > { %v1314_v5 = vpop.eup %1313  ;;  %v728_v57 = vpack.c.bf16 %v718_v53, %v717_v22  ;;  %v707_v26 = vmul.f32 %v1842_v38, %v693_v4 }
 0x154   : > { %v1316_v61 = vpop.eup %1315  ;;  %v722_v58 = vadd.f32 %v1847_v45, %v708_v25  ;;  %v532_v59 = vmul.f32 %v1314_v5, %v508_v2 }
 0x155   : > { %906 = vmatprep.mubr.bf16.mxu0 %v728_v57  ;;  %v721_v60 = vadd.f32 %v1847_v45, %v707_v26  ;;  %v531_v8 = vmul.f32 %v1316_v61, %v507_v7 }
 0x156   : > { %v546_v17 = vmul.f32 %v1880_v9, %v532_v59 }
 0x157   : > { %v1318_v24 = vpop.eup %1317  ;;  %v730_v33 = vpack.c.bf16 %v722_v58, %v721_v60  ;;  %v545_v38 = vmul.f32 %v1880_v9, %v531_v8 }
 0x158   : > { %v1320_v37 = vpop.eup %1319  ;;  %v560_v62 = vadd.f32 %v1891_v15, %v546_v17  ;;  %v536_v63 = vmul.f32 %v1318_v24, %v512_v30 }
 0x159   : > { %922 = vmatprep.mubr.bf16.mxu1 %v730_v33  ;;  %v559_v45 = vadd.f32 %v1891_v15, %v545_v38  ;;  %v535_v49 = vmul.f32 %v1320_v37, %v511_v31 }
 0x15a   : > { %v550_v35 = vmul.f32 %v1880_v9, %v536_v63 }
 0x15b   : > { %v724_v55 = vpack.c.bf16 %v560_v62, %v559_v45  ;;  %v549_v10 = vmul.f32 %v1880_v9, %v535_v49 }
 0x15c   : > { %v564_v50 = vadd.f32 %v1891_v15, %v550_v35 }
 0x15d   : > { %907 = vmatmul.mubr.bf16.gmra.mxu0 %v724_v55  ;;  %v563_v36 = vadd.f32 %v1891_v15, %v549_v10 }
 0x15f   : > { %v726_v56 = vpack.c.bf16 %v564_v50, %v563_v36 }
 0x161   : > { %923 = vmatmul.mubr.bf16.gmra.mxu1 %v726_v56 }
 0x1fd   : > { %v1174_v43 = vpop.f32.mrf.mxu0 }
 0x1ff   : > { %v1175_v11 = vpop.f32.mrf.mxu0 }
 0x200   : > { %v1176_v44 = vadd.f32 %v1175_v11, %v1174_v43 }
 0x201   : > { %v1177_v13 = vpop.f32.mrf.mxu0  ;;  %v1186_v14 = vpop.f32.mrf.mxu1 }
 0x202   : > { %v901_v16 = vadd.f32 %v1176_v44, %v1091_v12 }
 0x203   : > { %v1178_v18 = vpop.f32.mrf.mxu0  ;;  %v1187_v9 = vpop.f32.mrf.mxu1 }
 0x204   : > { %931 = vst [vmem:[%s1955_s13] sm:$0xff] %v901_v16  ;;  %v1179_v15 = vadd.f32 %v1178_v18, %v1177_v13  ;;  %v1188_v19 = vadd.f32 %v1187_v9, %v1186_v14 }
 0x205   : > { %v1189_v20 = vpop.f32.mrf.mxu1 }
 0x206   : > { %v904_v23 = vadd.f32 %v1179_v15, %v1091_v12  ;;  %v917_v27 = vadd.f32 %v1188_v19, %v1091_v12 }
 0x207   : > { %v1190_v28 = vpop.f32.mrf.mxu1 }
 0x208   : > { %932 = vst [vmem:[%s1955_s13 + $0x8] sm:$0xff] %v904_v23  ;;  %935 = vst [vmem:[%s1955_s13 + $0x20] sm:$0xff] %v917_v27  ;;  %v1191_v29 = vadd.f32 %v1190_v28, %v1189_v20 }
 0x20a   : > { %v920_v32 = vadd.f32 %v1191_v29, %v1091_v12 }
 0x20c   : > { %936 = vst [vmem:[%s1955_s13 + $0x28] sm:$0xff] %v920_v32 }
 0x21d   : > { %v1180_v34 = vpop.f32.mrf.mxu0 }
 0x21f   : > { %v1181_v41 = vpop.f32.mrf.mxu0 }
 0x220   : > { %v1182_v39 = vadd.f32 %v1181_v41, %v1180_v34 }
 0x221   : > { %v1183_v42 = vpop.f32.mrf.mxu0  ;;  %v1192_v3 = vpop.f32.mrf.mxu1 }
 0x222   : > { %v909_v6 = vadd.f32 %v1182_v39, %v1091_v12 }
 0x223   : > { %v1184_v0 = vpop.f32.mrf.mxu0  ;;  %v1193_v1 = vpop.f32.mrf.mxu1 }
 0x224   : > { %933 = vst [vmem:[%s1955_s13 + $0x10] sm:$0xff] %v909_v6  ;;  %v1185_v46 = vadd.f32 %v1184_v0, %v1183_v42  ;;  %v1194_v47 = vadd.f32 %v1193_v1, %v1192_v3 }
 0x225   : > { %v1195_v51 = vpop.f32.mrf.mxu1 }
 0x226   : > { %v912_v52 = vadd.f32 %v1185_v46, %v1091_v12  ;;  %v925_v40 = vadd.f32 %v1194_v47, %v1091_v12 }
 0x227   : > { %v1196_v21 = vpop.f32.mrf.mxu1 }
 0x228   : > { %934 = vst [vmem:[%s1955_s13 + $0x18] sm:$0xff] %v912_v52  ;;  %937 = vst [vmem:[%s1955_s13 + $0x30] sm:$0xff] %v925_v40  ;;  %v1197_v48 = vadd.f32 %v1196_v21, %v1195_v51  ;;  %946 = sbr.rel (!%p2055_p7) target bundleno = 584 (0x248), region = 68 }
 0x22a   : > { %v928_v53 = vadd.f32 %v1197_v48, %v1091_v12 }
 0x22c   : > { %938 = vst [vmem:[%s1955_s13 + $0x38] sm:$0xff] %v928_v53 }
 0x22d   : > { %s2069_s19 = smov (!%p949_p3, %s948_s19), 8 }
 0x22e   : > { %s1969_s26 = sshll.u32 %s2069_s19, 7 }
 0x22f   : > { %s953_s16 = ssub.s32 1024, %s1969_s26 }
 0x230   : > { %954 = vsyncadd %s940_s21, %s953_s16  ;;  %p1111_p8 = scmp.ne.s32.totalorder %s1969_s26, 0  ;;  %s1119_s17 = sshll.u32 %s1551_s9, 10 }
 0x231   : > { %s1979_s6 = scalar_lea.hbm %s2035_s8, %s1119_s17  ;;  %s959_s25 = sshll.u32 %s1955_s13, 4  ;;  %s1982_s25 = int_to_ptr.vmem [resolvable:$true] %s959_s25 }
 0x232   : > { %s1399_s22 = scalar_lea.vmem %s1982_s25, %s1969_s26  ;;  %s1482_s15 = smov [#allocation8]  }
 0x233   : > { %p1400_p9 = scmp.ne.s32.totalorder %s1982_s25, %s1399_s22  ;;  %s1403_s23 = sshll.u32 %s1482_s15, 4  ;;  %s1404_s23 = int_to_ptr.vmem [resolvable:$false] %s1403_s23 }
 0x234   : > { %s1405_s9 = scalar_lea.vmem %s1404_s23, 2048  ;;  %p1406_p1 = scmp.lt.s32.totalorder %s1982_s25, %s1404_s23 }
 0x235   : > { %p1401_p6 = pnand %p1400_p9, %p1111_p8  ;;  %p1407_p0 = scmp.lt.s32.totalorder %s1405_s9, %s1399_s22 }
 0x237   : > { %p1402_p12 = pneg %p1401_p6  ;;  %p1408_p4 = por %p1407_p0, %p1406_p1 }
 0x239   : > { %p1409_p10 = pnand %p1408_p4, %p1402_p12 }
 0x23b   : > { %1412 = shalt.err (!%p1409_p10)
}
 0x23c   : > { %s1413_s12 = scalar_lea.hbm %s1979_s6, %s1969_s26  ;;  %s1417_s13 = scalar_lea.hbm %s2035_s8, 1792 }
 0x23d   : > { %p1414_p11 = scmp.ne.s32.totalorder %s1979_s6, %s1413_s12  ;;  %p1418_p5 = scmp.lt.s32.totalorder %s1979_s6, %s2035_s8 }
 0x23e   : > { %p1419_p7 = scmp.lt.s32.totalorder %s1417_s13, %s1413_s12 }
 0x23f   : > { %p1415_p2 = pnand %p1414_p11, %p1111_p8 }
 0x240   : > { %p1420_p3 = por %p1419_p7, %p1418_p5 }
 0x241   : > { %p1416_p13 = pneg %p1415_p2 }
 0x243   : > { %p1421_p9 = pnand %p1420_p3, %p1416_p13 }
 0x245   : > { %1424 = shalt.err (!%p1421_p9)
}
 0x246   : > { %s1483_s16 = smov 128   ;;  %s1484_s17 = smov 8  }
 0x247   : > { %965 = dma.vmem_to_hbm [thread:$0]  (%p1111_p8), %s1982_s25, %s1969_s26, %s1979_s6, %s940_s21, %s1483_s16, %s1483_s16, %s1484_s17  }
 0x248 PF: > { %s2056_s20 = sld [smem:[#allocation15_spill]]  ;;  %s974_s11 = sand.u32 1, %s1459_s27  }
 0x249   : > { %p2058_p12 = scmp.ge.s32.totalorder %s1471_s30, 2  ;;  %s975_s22 = scalar_lea.sflag [#allocation4], %s974_s11 }
 0x24e   : > { %p2057_p6 = scmp.ne.s32.totalorder %s2056_s20, 0 }
 0x250   : > { %p1226_p1 = pnand %p2058_p12, %p2057_p6 }
 0x252   : > { %p1227_p0 = pneg %p1226_p1 }
 0x254   : > { %1454 = dma.done.wait (%p1227_p0), %s975_s22, 1024  }
 0x255   : > { %1456 = vsyncadd (%p1227_p0), %s975_s22, 4294966272  ;;  %s2059_s30 = sld [smem:[#allocation13_spill]]  ;;  %s2061_s27 = smov %s1463_s28 }
 0x256   : > { %s2060_s15 = sld [smem:[#allocation14_spill]]  ;;  %s2062_s28 = smov %s1467_s29 }
 0x25b   : > { %p24_p4 = scmp.ge.s32.totalorder %s2059_s30, 4  }
 0x25c   : > { %s2063_s29 = smov %s2060_s15 }
 0x25d   :  { %26 = sbr.rel (!%p24_p4) target bundleno = 9 (0x9), region = 114 }
 0x262   :  { %980 = vsyncpa [#allocation3], 1 }
 0x263   :  { %982 = vsyncpa [#allocation3 + $0x1], 1 }
 0x264   :  { %983 = vsyncpa [#allocation6], 1 }
 0x265   :  { %985 = vsyncpa [#allocation6 + $0x1], 1 }
 0x266   :  { %986 = vsyncpa [#allocation4], 1 }
 0x267   :  { %988 = vsyncpa [#allocation4 + $0x1], 1 }

</bundles_post_ra>
